<compile_context>
chip_gen: v5e
topology: v5e:2x2
jax: 0.10.0
libtpu: 0.0.40
codegen_flags: <defaults>
</compile_context>

<pallas_src>
import jax
import jax.numpy as jnp
from jax.experimental import pallas as pl
from jax.experimental.pallas import tpu as pltpu


def _layer_scale_kernel(gamma_ref, x_ref, o_ref):
    # gamma_ref : VMEM (1, D)   per-channel scale, resident across grid steps
    # x_ref     : VMEM (TM, D)  row tile of the flattened activations
    # o_ref     : VMEM (TM, D)  output tile (aliases x in HBM)
    o_ref[...] = x_ref[...] * gamma_ref[...]   # (1, D) broadcasts over (TM, D)


_TARGET_TILE_BYTES = 2 * 1024 * 1024  # ~2 MB per (TM, D) tile


def _row_tile(M, D, itemsize):
    """Rows per tile: ~2 MB, sublane-aligned (multiple of 8), capped at M."""
    tm = max(1, _TARGET_TILE_BYTES // (D * itemsize))
    if tm >= M:
        return M                      # single full-extent block (always legal)
    return max(8, (tm // 8) * 8)      # 8-row aligned; D stays full (lane-dense)


@jax.jit
def layer_scale(x, gamma):
    """Pallas LayerScale: y = x * gamma, gamma broadcast over leading dims."""
    orig_shape = x.shape
    D = orig_shape[-1]
    x2 = x.reshape(-1, D)             # flatten leading dims -> (M, D) rows
    M = x2.shape[0]
    gamma2 = gamma.astype(x.dtype).reshape(1, D)

    TM = _row_tile(M, D, x.dtype.itemsize)
    grid = (pl.cdiv(M, TM),)

    y2 = pl.pallas_call(
        _layer_scale_kernel,
        out_shape=jax.ShapeDtypeStruct((M, D), x.dtype),
        grid_spec=pltpu.PrefetchScalarGridSpec(
            num_scalar_prefetch=0,
            grid=grid,
            in_specs=[
                pl.BlockSpec((1, D), lambda i: (0, 0)),    # gamma (VMEM-resident)
                pl.BlockSpec((TM, D), lambda i: (i, 0)),   # x row tile
            ],
            out_specs=pl.BlockSpec((TM, D), lambda i: (i, 0)),
        ),
        compiler_params=pltpu.CompilerParams(
            dimension_semantics=("parallel",),
        ),
        input_output_aliases={1: 0},  # output aliases x (in-place friendly)
    )(gamma2, x2)
    return y2.reshape(orig_shape)


if __name__ == "__main__":
    # Small ViT-ish shapes: batch=2, tokens=16, hidden=128 (lane-friendly D).
    B, N, D = 2, 16, 128
    init_values = 1e-5

    root = jax.random.PRNGKey(0)
    kx, kg = jax.random.split(root)
    x = jax.random.normal(kx, (B, N, D), dtype=jnp.float32)

    # (a) freshly-initialised LayerScale: gamma = init_values * ones(D)
    gamma_init = jnp.full((D,), init_values, dtype=jnp.float32)
    # (b) a "trained" gamma (random) to exercise the per-channel broadcast
    gamma_trained = jax.random.normal(kg, (D,), dtype=jnp.float32)

    for gamma in (gamma_init, gamma_trained):
        y_ref = x * gamma             # pure-JAX reference (computed before the
                                      # aliased kernel call, defensively)
        y = jax.block_until_ready(layer_scale(x, gamma))
        assert y.shape == x.shape and y.dtype == x.dtype
        assert jnp.allclose(y, y_ref, atol=1e-6, rtol=1e-6), "LayerScale mismatch"

    print("KERNEL_OK")
</pallas_src>

<mosaic_0001>
module attributes {stable_mosaic.version = 11 : i64} {
  func.func @_layer_scale_kernel(%arg0: i32, %arg1: memref<1x128xf32, #tpu.memory_space<vmem>>, %arg2: memref<32x128xf32, #tpu.memory_space<vmem>>, %arg3: memref<32x128xf32, #tpu.memory_space<vmem>>) attributes {dimension_semantics = [#tpu.dimension_semantics<parallel>], iteration_bounds = array<i64: 1>, scalar_prefetch = 0 : i64, scratch_operands = 0 : i64, tpu.core_type = #tpu.core_type<tc>, window_params = [{pipeline_mode = #tpu.pipeline_mode<synchronous>, transform_indices = @transform_0, window_bounds = array<i64: 1, 128>}, {transform_indices = @transform_1, window_bounds = array<i64: 32, 128>}, {transform_indices = @transform_2, window_bounds = array<i64: 32, 128>}]} {
    %c0 = arith.constant 0 : index
    %c0_0 = arith.constant 0 : index
    %0 = vector.load %arg2[%c0, %c0_0] : memref<32x128xf32, #tpu.memory_space<vmem>>, vector<32x128xf32>
    %c0_1 = arith.constant 0 : index
    %c0_2 = arith.constant 0 : index
    %1 = vector.load %arg1[%c0_1, %c0_2] : memref<1x128xf32, #tpu.memory_space<vmem>>, vector<1x128xf32>
    %2 = vector.broadcast %1 : vector<1x128xf32> to vector<32x128xf32>
    %3 = arith.mulf %0, %2 : vector<32x128xf32>
    %c0_3 = arith.constant 0 : index
    %c0_4 = arith.constant 0 : index
    %4 = vector.load %arg3[%c0_3, %c0_4] : memref<32x128xf32, #tpu.memory_space<vmem>>, vector<32x128xf32>
    tpu.vector_store %arg3[%c0_3, %c0_4], %3 {strides = array<i32>} : memref<32x128xf32, #tpu.memory_space<vmem>>, vector<32x128xf32>,
    return
  }
  func.func @transform_0(%arg0: i32) -> (i32, i32) {
    %c0_i32 = arith.constant 0 : i32
    %c0_i32_0 = arith.constant 0 : i32
    %c0_i32_1 = arith.constant 0 : i32
    return %c0_i32, %c0_i32_0 : i32, i32
  }
  func.func @transform_1(%arg0: i32) -> (i32, i32) {
    %c0_i32 = arith.constant 0 : i32
    %c0_i32_0 = arith.constant 0 : i32
    return %arg0, %c0_i32 : i32, i32
  }
  func.func @transform_2(%arg0: i32) -> (i32, i32) {
    %c0_i32 = arith.constant 0 : i32
    %c0_i32_0 = arith.constant 0 : i32
    return %arg0, %c0_i32 : i32, i32
  }
}

</mosaic_0001>

<bundles_post_ra>
// kernel: layer_scale.1
= control target key start
LH: loop header
LB: loop body
LE: loop exit
PB: predicated region body
PF: predicated region fallthrough
CT: control target
= control target key end

     0   :  { %s74_s0 = inlined_call_operand.vmem [shape: f32[1,128], index: 0, kind: input, shape index: {}]   ;;  %s75_s1 = inlined_call_operand.vmem [shape: f32[32,128], index: 1, kind: input, shape index: {}, may-alias: {1,2}]   ;;  %s76_s2 = inlined_call_operand.vmem [shape: f32[32,128], index: 2, kind: output, shape index: {}, may-alias: {1,2}]  }
   0x1   :  { %v11_v0 = vld [vmem:[%s75_s1] sm:$0xff]  ;;  %v12_v2 = vld [vmem:[%s75_s1 + $0x8] sm:$0xff]  ;;  %v13_v3 = vld [vmem:[%s75_s1 + $0x10] sm:$0xff] }
   0x2   :  { %v31_v1 = vld [vmem:[%s74_s0] ss:$0 sm:$0xff]  ;;  %v14_v4 = vld [vmem:[%s75_s1 + $0x18] sm:$0xff] }
   0x3   :  { %v19_v5 = vmul.f32 %v31_v1, %v11_v0  ;;  %v20_v6 = vmul.f32 %v31_v1, %v12_v2  ;;  %v21_v7 = vmul.f32 %v31_v1, %v13_v3  ;;  %v22_v8 = vmul.f32 %v31_v1, %v14_v4 }
   0x5   :  { %23 = vst [vmem:[%s76_s2] sm:$0xff] %v19_v5 }
   0x6   :  { %24 = vst [vmem:[%s76_s2 + $0x8] sm:$0xff] %v20_v6 }
   0x7   :  { %25 = vst [vmem:[%s76_s2 + $0x10] sm:$0xff] %v21_v7 }
   0x8   :  { %26 = vst [vmem:[%s76_s2 + $0x18] sm:$0xff] %v22_v8 }

</bundles_post_ra>
